<compile_context>
chip_gen: v6e
topology: v6e:2x2x1
jax: 0.10.0
libtpu: 0.0.40
codegen_flags: <defaults>
</compile_context>

<pallas_src>
import jax
import jax.numpy as jnp
from jax.experimental import pallas as pl
from jax.experimental.pallas import tpu as pltpu


def _elementwise_kernel(x_ref, o_ref):
    x = x_ref[...]
    # constants folded: ((x + 2 - 3) * 4 / 5) ** 2  ->  t = (x - 1) * 0.8; t*t
    t = (x - 1.0) * 0.8
    o_ref[...] = t * t


_LANE = 1024        # wide lane-dense last dim -> unmasked full-width stores
_BLOCK_ROWS = 512   # 512 x 1024 f32 = 2 MiB per tile; 2 arrays x 2 bufs = 8 MiB VMEM


def pt_module_forward(x):
    """Applies ((x + 2 - 3) * 4 / 5) ** 2 elementwise, matching PtModule.forward."""
    orig_shape = x.shape
    flat = x.reshape(-1)
    n = flat.shape[0]

    rows = -(-n // _LANE)                               # ceil(n / LANE)
    block_rows = min(_BLOCK_ROWS, rows)
    rows_padded = -(-rows // block_rows) * block_rows   # round rows up to block
    padded_n = rows_padded * _LANE

    if padded_n != n:
        # single pad op; skipped entirely when n is already tile-aligned
        flat = jnp.pad(flat, (0, padded_n - n))
    x2d = flat.reshape(rows_padded, _LANE)

    grid = (rows_padded // block_rows,)

    out2d = pl.pallas_call(
        _elementwise_kernel,
        out_shape=jax.ShapeDtypeStruct(x2d.shape, x.dtype),
        grid_spec=pltpu.PrefetchScalarGridSpec(
            num_scalar_prefetch=0,
            grid=grid,
            in_specs=[pl.BlockSpec((block_rows, _LANE), lambda i: (i, 0))],
            out_specs=pl.BlockSpec((block_rows, _LANE), lambda i: (i, 0)),
        ),
        compiler_params=pltpu.CompilerParams(
            # lets Mosaic shard the grid across both TensorCores on v7x;
            # harmless no-op on v5e/v6e
            dimension_semantics=("parallel",),
        ),
    )(x2d)

    out_flat = out2d.reshape(-1)
    if padded_n != n:
        out_flat = out_flat[:n]
    return out_flat.reshape(orig_shape)


if __name__ == "__main__":
    key = jax.random.PRNGKey(0)
    x = jax.random.normal(key, (2, 4, 16, 16), dtype=jnp.float32)

    out = pt_module_forward(x)
    jax.block_until_ready(out)

    # reference check in plain JAX (original un-folded formula)
    ref = ((x + 2.0 - 3.0) * 4.0 / 5.0) ** 2
    assert out.shape == x.shape
    assert jnp.allclose(out, ref, rtol=1e-5, atol=1e-6), "mismatch vs reference"

    print("KERNEL_OK")
</pallas_src>

<mosaic_0001>
module attributes {stable_mosaic.version = 11 : i64} {
  func.func @_elementwise_kernel(%arg0: i32, %arg1: memref<2x1024xf32, #tpu.memory_space<vmem>>, %arg2: memref<2x1024xf32, #tpu.memory_space<vmem>>) attributes {dimension_semantics = [#tpu.dimension_semantics<parallel>], iteration_bounds = array<i64: 1>, scalar_prefetch = 0 : i64, scratch_operands = 0 : i64, tpu.core_type = #tpu.core_type<tc>, window_params = [{transform_indices = @transform_0, window_bounds = array<i64: 2, 1024>}, {transform_indices = @transform_1, window_bounds = array<i64: 2, 1024>}]} {
    %c0 = arith.constant 0 : index
    %c0_0 = arith.constant 0 : index
    %0 = vector.load %arg1[%c0, %c0_0] : memref<2x1024xf32, #tpu.memory_space<vmem>>, vector<2x1024xf32>
    %cst = arith.constant 1.000000e+00 : f32
    %1 = vector.broadcast %cst : f32 to vector<2x1024xf32>
    %2 = arith.subf %0, %1 : vector<2x1024xf32>
    %cst_1 = arith.constant 8.000000e-01 : f32
    %3 = vector.broadcast %cst_1 : f32 to vector<2x1024xf32>
    %4 = arith.mulf %2, %3 : vector<2x1024xf32>
    %5 = arith.mulf %4, %4 : vector<2x1024xf32>
    %c0_2 = arith.constant 0 : index
    %c0_3 = arith.constant 0 : index
    %6 = vector.load %arg2[%c0_2, %c0_3] : memref<2x1024xf32, #tpu.memory_space<vmem>>, vector<2x1024xf32>
    tpu.vector_store %arg2[%c0_2, %c0_3], %5 {strides = array<i32>} : memref<2x1024xf32, #tpu.memory_space<vmem>>, vector<2x1024xf32>,
    return
  }
  func.func @transform_0(%arg0: i32) -> (i32, i32) {
    %c0_i32 = arith.constant 0 : i32
    %c0_i32_0 = arith.constant 0 : i32
    return %arg0, %c0_i32 : i32, i32
  }
  func.func @transform_1(%arg0: i32) -> (i32, i32) {
    %c0_i32 = arith.constant 0 : i32
    %c0_i32_0 = arith.constant 0 : i32
    return %arg0, %c0_i32 : i32, i32
  }
}

</mosaic_0001>

<bundles_post_ra>
// kernel: tpu_custom_call.1
= control target key start
LH: loop header
LB: loop body
LE: loop exit
PB: predicated region body
PF: predicated region fallthrough
CT: control target
= control target key end

     0   :  { %6 = vsyncpa [#allocation3], 0  ;;  %s112_s0 = inlined_call_operand.hbm [shape: f32[2,1024], index: 0, kind: input, shape index: {}]   ;;  %s113_s1 = inlined_call_operand.hbm [shape: f32[2,1024], index: 1, kind: output, shape index: {}]  }
   0x1   :  { %7 = vsyncpa [#allocation4], 0  ;;  %s94_s6 = smov [#allocation2]  }
   0x2   :  { %s14_s7 = sshll.u32 %s94_s6, 4  ;;  %s15_s7 = int_to_ptr.vmem [resolvable:$true] %s14_s7 }
   0x3   :  { %s58_s8 = scalar_lea.vmem %s15_s7, 256  ;;  %p63_p1 = scmp.lt.s32.totalorder %s15_s7, %s15_s7 }
   0x4   :  { %p59_p0 = scmp.ne.s32.totalorder %s15_s7, %s58_s8  ;;  %p64_p2 = scmp.lt.s32.totalorder %s58_s8, %s58_s8 }
   0x6   :  { %p65_p3 = por %p64_p2, %p63_p1 }
   0x8   :  { %p66_p4 = pnand %p65_p3, %p59_p0 }
   0xa   :  { %69 = shalt.err (!%p66_p4)
}
   0xb   :  { %17 = dma.hbm_to_vmem [thread:$0]  %s112_s0, 256, %s15_s7, [#allocation3]  }
   0xc   :  { %90 = dma.done.wait [#allocation3], 256  }
   0xd   :  { %91 = vsyncadd [#allocation3], 4294967040  ;;  %v21_v0 = vld [vmem:[#allocation2] sm:$0xff]  ;;  %v22_v1 = vld [vmem:[#allocation2 + $0x8] sm:$0xff]  ;;  %s95_s11 = smov [#allocation5]  }
   0xe   :  { %v46_v2 = vadd.f32 -1.0, %v21_v0  ;;  %v47_v3 = vadd.f32 -1.0, %v22_v1  ;;  %s37_s12 = sshll.u32 %s95_s11, 4  ;;  %s38_s12 = int_to_ptr.vmem [resolvable:$true] %s37_s12 }
   0xf   :  { %s70_s13 = scalar_lea.vmem %s38_s12, 256  ;;  %p75_p6 = scmp.lt.s32.totalorder %s38_s12, %s38_s12 }
  0x10   :  { %v25_v4 = vmul.f32 0.8, %v46_v2  ;;  %v26_v5 = vmul.f32 0.8, %v47_v3  ;;  %p71_p5 = scmp.ne.s32.totalorder %s38_s12, %s70_s13  ;;  %p76_p7 = scmp.lt.s32.totalorder %s70_s13, %s70_s13 }
  0x12   :  { %v27_v6 = vmul.f32 %v25_v4, %v25_v4  ;;  %v28_v7 = vmul.f32 %v26_v5, %v26_v5  ;;  %p77_p8 = por %p76_p7, %p75_p6 }
  0x14   :  { %29 = vst [vmem:[#allocation5] sm:$0xff] %v27_v6  ;;  %30 = vst [vmem:[#allocation5 + $0x8] sm:$0xff] %v28_v7  ;;  %p78_p9 = pnand %p77_p8, %p71_p5 }
  0x16   :  { %81 = shalt.err (!%p78_p9)
}
  0x17   :  { %40 = dma.vmem_to_hbm [thread:$0]  %s38_s12, 256, %s113_s1, [#allocation4]  }
  0x18   :  { %92 = dma.done.wait [#allocation4], 256  }
  0x19   :  { %93 = vsyncadd [#allocation4], 4294967040 }
  0x1a   :  { %44 = vsyncpa [#allocation3], 1 }
  0x1b   :  { %45 = vsyncpa [#allocation4], 1 }

</bundles_post_ra>
